<compile_context>
chip_gen: v7x
topology: tpu7x:2x2x1
jax: 0.10.0
libtpu: 0.0.40
codegen_flags: <defaults>
</compile_context>

<pallas_src>
import functools
from typing import List, Tuple

import jax
import jax.numpy as jnp
from jax.experimental import pallas as pl
from jax.experimental.pallas import tpu as pltpu

_LANE = 128                      # lane width for internal (hidden) activations
_ROW_ALIGN = 16                  # row alignment of batch tiles (bf16 sublane packing)
_VMEM_TILE_BUDGET = 24 << 20     # bytes budgeted for streamed tiles + f32 intermediates
_SINGLE_TILE_MAX = 512           # below this many rows, one full-extent tile (grid=1)
_TM_MAX = 2048                   # cap rows/tile (per-step overhead already amortized)


def _round_up(x: int, m: int) -> int:
    return ((x + m - 1) // m) * m


def _mlp_fused_kernel(x_ref, *rest, num_layers: int, sigmoid_output: bool, compute_dtype):
    """Whole MLP for one batch tile; inter-layer activations never leave VMEM/vregs.

    rest = (w_0, b_0, ..., w_{L-1}, b_{L-1}, o_ref)
      x_ref: (tm, K)   w_i: (Ki, Ni)   b_i: (1, Ni)   o_ref: (tm, N_out)
    Hidden widths are zero-padded to 128 lanes (padded lanes stay exactly 0 through
    Linear+ReLU); input K and final N_out are unpadded.  Rows past the true batch in
    the ragged last tile contain garbage but are dropped by the masked writeback.
    """
    o_ref = rest[-1]
    wb = rest[:-1]
    h = x_ref[...]                                   # already compute_dtype (bf16/f32)
    for i in range(num_layers):
        w = wb[2 * i][...]
        b = wb[2 * i + 1][...]
        acc = jnp.dot(h, w, preferred_element_type=jnp.float32)   # MXU, f32 accumulate
        acc = acc + b                                              # f32 epilogue (VPU)
        if i < num_layers - 1:
            # ReLU then a single cast back to the MXU operand dtype for the next layer.
            h = jnp.maximum(acc, 0.0).astype(compute_dtype)
        else:
            h = acc
    if sigmoid_output:
        # exp + (exact) reciprocal both occupy the otherwise-idle EUP slot.
        h = pl.reciprocal(1.0 + jnp.exp(-h), approx=False)
    o_ref[...] = h.astype(o_ref.dtype)


class MLPPallas:
    """Mirror of the PyTorch MLP; forward runs as one fused Pallas kernel."""

    def __init__(self, input_dim: int, hidden_dim: int, output_dim: int,
                 num_layers: int, sigmoid_output: bool = False,
                 key: jax.Array = None, param_dtype=jnp.bfloat16):
        self.num_layers = num_layers
        self.sigmoid_output = sigmoid_output
        self.input_dim = input_dim
        self.output_dim = output_dim
        self.param_dtype = jnp.dtype(param_dtype)

        h = [hidden_dim] * (num_layers - 1)
        dims: List[Tuple[int, int]] = list(zip([input_dim] + h, h + [output_dim]))
        if key is None:
            key = jax.random.PRNGKey(0)

        self.ref_params = []      # (W_t (in,out) f32 after param-dtype rounding, b f32)
        self.padded_params = []   # (W (in_pad,out_pad) param_dtype, b (1,out_pad) f32)
        for li, (n_in, n_out) in enumerate(dims):
            key, kw, kb = jax.random.split(key, 3)
            bound = 1.0 / (n_in ** 0.5)               # nn.Linear-style U(-1/sqrt(in), ..)
            w = jax.random.uniform(kw, (n_out, n_in), jnp.float32, -bound, bound)
            b = jax.random.uniform(kb, (n_out,), jnp.float32, -bound, bound)
            w_t = jnp.transpose(w)                    # (in, out)
            w_q = w_t.astype(self.param_dtype)
            self.ref_params.append((w_q.astype(jnp.float32), b))
            # Pad only internal hidden widths (no HBM cost: weights are VMEM-resident and
            # hidden activations never leave the kernel).  Input K / final N stay unpadded
            # so no wrapper-side zero-pad / slice HBM round trips are needed.
            in_pad = n_in if li == 0 else _round_up(n_in, _LANE)
            out_pad = n_out if li == num_layers - 1 else _round_up(n_out, _LANE)
            w_p = jnp.zeros((in_pad, out_pad), self.param_dtype).at[:n_in, :n_out].set(w_q)
            b_p = jnp.zeros((1, out_pad), jnp.float32).at[0, :n_out].set(b)
            self.padded_params.append((w_p, b_p))

        self.flat_wb = []
        for (w_p, b_p) in self.padded_params:
            self.flat_wb += [w_p, b_p]
        self._weight_bytes = int(sum(a.size * a.dtype.itemsize for a in self.flat_wb))
        self._max_width = max([self.padded_params[0][0].shape[0]]
                              + [w.shape[1] for (w, _) in self.padded_params])
        self._fwd_cache = {}
        self._single_buffer_weights = None   # probed on first call (pl.Buffered(1))

    # ---------------------------------------------------------------- tiling / VMEM --
    def _pick_tile(self, M: int):
        if M <= _SINGLE_TILE_MAX:
            return M, 1                               # full-extent block, always legal
        itemsize = self.param_dtype.itemsize
        per_row = (2 * self.input_dim * itemsize      # double-buffered x tile
                   + 2 * self.output_dim * 4          # double-buffered out tile
                   + 4 * self._max_width * 4)         # live f32 intermediates (headroom)
        bufs = 1 if self._single_buffer_weights else 2
        avail = _VMEM_TILE_BUDGET - bufs * self._weight_bytes
        tm_cap = max(_ROW_ALIGN,
                     min(_TM_MAX, (avail // max(per_row, 1)) // _ROW_ALIGN * _ROW_ALIGN))
        # TODO(synk): if resident weights alone blow the VMEM budget, add a K grid axis
        # with a pl.when-init f32 accumulator instead of shrinking tm further.
        grid_n = max(2, pl.cdiv(M, tm_cap))
        if grid_n % 2:
            grid_n += 1            # even grid -> balanced load on v7x's 2 TensorCores
        tm = _round_up(pl.cdiv(M, grid_n), _ROW_ALIGN)
        grid_n = pl.cdiv(M, tm)    # ragged last tile handled by Pallas (masked writeback)
        return tm, grid_n

    def _build_forward(self, M: int, K: int, tm: int, grid_n: int, single_buffered: bool):
        compute_dtype = self.param_dtype
        out_dim = self.output_dim

        in_specs = [pl.BlockSpec((tm, K), lambda i: (i, 0))]       # streamed x tiles
        for (w_p, b_p) in self.padded_params:
            kin, nout = w_p.shape
            if single_buffered:
                # Constant-index blocks: one VMEM buffer is enough (halves footprint).
                in_specs.append(pl.BlockSpec((kin, nout), lambda i: (0, 0),
                                             pipeline_mode=pl.Buffered(1)))
                in_specs.append(pl.BlockSpec((1, nout), lambda i: (0, 0),
                                             pipeline_mode=pl.Buffered(1)))
            else:
                in_specs.append(pl.BlockSpec((kin, nout), lambda i: (0, 0)))
                in_specs.append(pl.BlockSpec((1, nout), lambda i: (0, 0)))

        kernel = functools.partial(_mlp_fused_kernel,
                                   num_layers=self.num_layers,
                                   sigmoid_output=self.sigmoid_output,
                                   compute_dtype=compute_dtype)

        bufs = 1 if single_buffered else 2
        est = (bufs * self._weight_bytes
               + 2 * tm * K * compute_dtype.itemsize
               + 2 * tm * out_dim * 4
               + 4 * tm * self._max_width * 4)
        # Explicit scoped-VMEM limit: no-op for tiny nets (stays at 32 MiB) but fails
        # loudly / unlocks larger tiles on v5e (16 MiB scoped default) and v7x (64 MiB
        # physical) instead of silently spilling.
        vmem_limit = int(min(max(2 * est, 32 << 20), 64 << 20))

        call = pl.pallas_call(
            kernel,
            out_shape=jax.ShapeDtypeStruct((M, out_dim), jnp.float32),
            grid_spec=pltpu.PrefetchScalarGridSpec(
                num_scalar_prefetch=0,
                grid=(grid_n,),
                in_specs=in_specs,
                out_specs=pl.BlockSpec((tm, out_dim), lambda i: (i, 0)),
            ),
            compiler_params=pltpu.CompilerParams(
                dimension_semantics=("parallel",),
                vmem_limit_bytes=vmem_limit),
        )

        def fwd(x2, *flat_wb):
            # Cast to the MXU operand dtype here so the bf16 narrowing of the streamed
            # x bytes fuses under jit with whatever produced x (halves x DMA traffic).
            return call(x2.astype(compute_dtype), *flat_wb)

        return jax.jit(fwd)

    # ------------------------------------------------------------------------ forward --
    def __call__(self, x: jax.Array) -> jax.Array:
        lead = x.shape[:-1]
        x2 = x.reshape((-1, x.shape[-1]))
        M, K = x2.shape
        tm, grid_n = self._pick_tile(M)

        def run(single_buffered: bool):
            key = (M, K, str(x2.dtype), tm, grid_n, single_buffered)
            fn = self._fwd_cache.get(key)
            if fn is None:
                fn = self._build_forward(M, K, tm, grid_n, single_buffered)
                self._fwd_cache[key] = fn
            return fn(x2, *self.flat_wb)

        if self._single_buffer_weights is None:
            # Probe single-buffered constant blocks; fall back if this Pallas build
            # rejects pl.Buffered(1).
            try:
                out2 = jax.block_until_ready(run(True))
                self._single_buffer_weights = True
            except Exception:
                self._single_buffer_weights = False
                out2 = run(False)
        else:
            out2 = run(self._single_buffer_weights)

        return out2.reshape(lead + (self.output_dim,))


def _reference_mlp(mlp: MLPPallas, x: jax.Array) -> jax.Array:
    """Plain-JAX reference using the (dtype-rounded) unpadded weights."""
    lead = x.shape[:-1]
    h = x.reshape((-1, x.shape[-1])).astype(jnp.float32)
    n = len(mlp.ref_params)
    for i, (w_t, b) in enumerate(mlp.ref_params):
        h = h @ w_t + b
        if i < n - 1:
            h = jnp.maximum(h, 0.0)
    if mlp.sigmoid_output:
        h = jax.nn.sigmoid(h)
    return h.reshape(lead + (h.shape[-1],))


if __name__ == "__main__":
    key = jax.random.PRNGKey(0)
    kx, kx3, kxl, kp, kp2, kx2 = jax.random.split(key, 6)

    batch, input_dim, hidden_dim, output_dim, num_layers = 8, 32, 32, 16, 3

    # Default path: bf16 MXU operands (weights + streamed x), f32 accumulation/epilogue.
    mlp = MLPPallas(input_dim, hidden_dim, output_dim, num_layers,
                    sigmoid_output=True, key=kp)                  # param_dtype=bf16
    tol_bf16 = dict(atol=2e-2, rtol=2e-2)   # bf16 activation rounding across 3 layers

    # 1) Small 2-D batch.
    x = jax.random.normal(kx, (batch, input_dim), jnp.float32)
    out = jax.block_until_ready(mlp(x))
    ref = _reference_mlp(mlp, x)
    assert out.shape == (batch, output_dim), out.shape
    assert jnp.allclose(out, ref, **tol_bf16), "mismatch (bf16, 2-D batch)"

    # 2) Leading-dims input (PyTorch-style extra batch dims).
    x3 = jax.random.normal(kx3, (2, 4, input_dim), jnp.float32)
    out3 = jax.block_until_ready(mlp(x3))
    ref3 = _reference_mlp(mlp, x3)
    assert out3.shape == (2, 4, output_dim), out3.shape
    assert jnp.allclose(out3, ref3, **tol_bf16), "mismatch (bf16, 3-D batch)"

    # 3) Ragged batch: exercises the even "parallel" M grid and the partial last tile.
    xl = jax.random.normal(kxl, (1030, input_dim), jnp.float32)
    outl = jax.block_until_ready(mlp(xl))
    refl = _reference_mlp(mlp, xl)
    assert outl.shape == (1030, output_dim), outl.shape
    assert jnp.allclose(outl, refl, **tol_bf16), "mismatch (bf16, tiled batch)"

    # 4) f32-parameter path (exact numerics, no sigmoid) at tight tolerance.
    mlp32 = MLPPallas(input_dim, hidden_dim, output_dim, num_layers,
                      sigmoid_output=False, key=kp2, param_dtype=jnp.float32)
    xf = jax.random.normal(kx2, (batch, input_dim), jnp.float32)
    outf = jax.block_until_ready(mlp32(xf))
    reff = _reference_mlp(mlp32, xf)
    assert outf.shape == (batch, output_dim), outf.shape
    assert jnp.allclose(outf, reff, atol=1e-5, rtol=1e-5), "mismatch (f32 path)"

    print("KERNEL_OK")
</pallas_src>

<mosaic_0001>
module attributes {stable_mosaic.version = 11 : i64} {
  func.func @_mlp_fused_kernel(%arg0: i32, %arg1: memref<8x32xbf16, #tpu.memory_space<vmem>>, %arg2: memref<32x128xbf16, #tpu.memory_space<vmem>>, %arg3: memref<1x128xf32, #tpu.memory_space<vmem>>, %arg4: memref<128x128xbf16, #tpu.memory_space<vmem>>, %arg5: memref<1x128xf32, #tpu.memory_space<vmem>>, %arg6: memref<128x16xbf16, #tpu.memory_space<vmem>>, %arg7: memref<1x16xf32, #tpu.memory_space<vmem>>, %arg8: memref<8x16xf32, #tpu.memory_space<vmem>>) attributes {dimension_semantics = [#tpu.dimension_semantics<parallel>], iteration_bounds = array<i64: 1>, scalar_prefetch = 0 : i64, scratch_operands = 0 : i64, tpu.core_type = #tpu.core_type<tc>, window_params = [{transform_indices = @transform_0, window_bounds = array<i64: 8, 32>}, {pipeline_mode = #tpu.pipeline_mode<synchronous>, transform_indices = @transform_1, window_bounds = array<i64: 32, 128>}, {pipeline_mode = #tpu.pipeline_mode<synchronous>, transform_indices = @transform_2, window_bounds = array<i64: 1, 128>}, {pipeline_mode = #tpu.pipeline_mode<synchronous>, transform_indices = @transform_3, window_bounds = array<i64: 128, 128>}, {pipeline_mode = #tpu.pipeline_mode<synchronous>, transform_indices = @transform_4, window_bounds = array<i64: 1, 128>}, {pipeline_mode = #tpu.pipeline_mode<synchronous>, transform_indices = @transform_5, window_bounds = array<i64: 128, 16>}, {pipeline_mode = #tpu.pipeline_mode<synchronous>, transform_indices = @transform_6, window_bounds = array<i64: 1, 16>}, {transform_indices = @transform_7, window_bounds = array<i64: 8, 16>}]} {
    %c0 = arith.constant 0 : index
    %c0_0 = arith.constant 0 : index
    %0 = vector.load %arg1[%c0, %c0_0] : memref<8x32xbf16, #tpu.memory_space<vmem>>, vector<8x32xbf16>
    %c0_1 = arith.constant 0 : index
    %c0_2 = arith.constant 0 : index
    %1 = vector.load %arg2[%c0_1, %c0_2] : memref<32x128xbf16, #tpu.memory_space<vmem>>, vector<32x128xbf16>
    %c0_3 = arith.constant 0 : index
    %c0_4 = arith.constant 0 : index
    %2 = vector.load %arg3[%c0_3, %c0_4] : memref<1x128xf32, #tpu.memory_space<vmem>>, vector<1x128xf32>
    %cst = arith.constant dense<0.000000e+00> : vector<8x128xf32>
    %3 = tpu.matmul %0, %1, %cst {dimension_numbers = #tpu.dot_dimension_numbers<[1], [0], [0], [1], [0, 0, 1, 1], [], []>} : vector<8x32xbf16>, vector<32x128xbf16>, vector<8x128xf32> -> vector<8x128xf32>
    %4 = vector.broadcast %2 : vector<1x128xf32> to vector<8x128xf32>
    %5 = arith.addf %3, %4 : vector<8x128xf32>
    %cst_5 = arith.constant 0.000000e+00 : f32
    %6 = vector.broadcast %cst_5 : f32 to vector<8x128xf32>
    %7 = arith.maximumf %5, %6 : vector<8x128xf32>
    %8 = arith.truncf %7 : vector<8x128xf32> to vector<8x128xbf16>
    %c0_6 = arith.constant 0 : index
    %c0_7 = arith.constant 0 : index
    %9 = vector.load %arg4[%c0_6, %c0_7] : memref<128x128xbf16, #tpu.memory_space<vmem>>, vector<128x128xbf16>
    %c0_8 = arith.constant 0 : index
    %c0_9 = arith.constant 0 : index
    %10 = vector.load %arg5[%c0_8, %c0_9] : memref<1x128xf32, #tpu.memory_space<vmem>>, vector<1x128xf32>
    %cst_10 = arith.constant dense<0.000000e+00> : vector<8x128xf32>
    %11 = tpu.matmul %8, %9, %cst_10 {dimension_numbers = #tpu.dot_dimension_numbers<[1], [0], [0], [1], [0, 0, 1, 1], [], []>} : vector<8x128xbf16>, vector<128x128xbf16>, vector<8x128xf32> -> vector<8x128xf32>
    %12 = vector.broadcast %10 : vector<1x128xf32> to vector<8x128xf32>
    %13 = arith.addf %11, %12 : vector<8x128xf32>
    %cst_11 = arith.constant 0.000000e+00 : f32
    %14 = vector.broadcast %cst_11 : f32 to vector<8x128xf32>
    %15 = arith.maximumf %13, %14 : vector<8x128xf32>
    %16 = arith.truncf %15 : vector<8x128xf32> to vector<8x128xbf16>
    %c0_12 = arith.constant 0 : index
    %c0_13 = arith.constant 0 : index
    %17 = vector.load %arg6[%c0_12, %c0_13] : memref<128x16xbf16, #tpu.memory_space<vmem>>, vector<128x16xbf16>
    %c0_14 = arith.constant 0 : index
    %c0_15 = arith.constant 0 : index
    %18 = vector.load %arg7[%c0_14, %c0_15] : memref<1x16xf32, #tpu.memory_space<vmem>>, vector<1x16xf32>
    %cst_16 = arith.constant dense<0.000000e+00> : vector<8x16xf32>
    %19 = tpu.matmul %16, %17, %cst_16 {dimension_numbers = #tpu.dot_dimension_numbers<[1], [0], [0], [1], [0, 0, 1, 1], [], []>} : vector<8x128xbf16>, vector<128x16xbf16>, vector<8x16xf32> -> vector<8x16xf32>
    %20 = vector.broadcast %18 : vector<1x16xf32> to vector<8x16xf32>
    %21 = arith.addf %19, %20 : vector<8x16xf32>
    %cst_17 = arith.constant 0.000000e+00 : f32
    %22 = vector.broadcast %cst_17 : f32 to vector<8x16xf32>
    %23 = arith.subf %22, %21 : vector<8x16xf32>
    %24 = math.exp %23 : vector<8x16xf32>
    %cst_18 = arith.constant 1.000000e+00 : f32
    %25 = vector.broadcast %cst_18 : f32 to vector<8x16xf32>
    %26 = arith.addf %25, %24 : vector<8x16xf32>
    %27 = tpu.reciprocal %26 : vector<8x16xf32> -> vector<8x16xf32>
    %c0_19 = arith.constant 0 : index
    %c0_20 = arith.constant 0 : index
    %28 = vector.load %arg8[%c0_19, %c0_20] : memref<8x16xf32, #tpu.memory_space<vmem>>, vector<8x16xf32>
    tpu.vector_store %arg8[%c0_19, %c0_20], %27 {strides = array<i32>} : memref<8x16xf32, #tpu.memory_space<vmem>>, vector<8x16xf32>,
    return
  }
  func.func @transform_0(%arg0: i32) -> (i32, i32) {
    %c0_i32 = arith.constant 0 : i32
    %c0_i32_0 = arith.constant 0 : i32
    return %arg0, %c0_i32 : i32, i32
  }
  func.func @transform_1(%arg0: i32) -> (i32, i32) {
    %c0_i32 = arith.constant 0 : i32
    %c0_i32_0 = arith.constant 0 : i32
    %c0_i32_1 = arith.constant 0 : i32
    return %c0_i32, %c0_i32_0 : i32, i32
  }
  func.func @transform_2(%arg0: i32) -> (i32, i32) {
    %c0_i32 = arith.constant 0 : i32
    %c0_i32_0 = arith.constant 0 : i32
    %c0_i32_1 = arith.constant 0 : i32
    return %c0_i32, %c0_i32_0 : i32, i32
  }
  func.func @transform_3(%arg0: i32) -> (i32, i32) {
    %c0_i32 = arith.constant 0 : i32
    %c0_i32_0 = arith.constant 0 : i32
    %c0_i32_1 = arith.constant 0 : i32
    return %c0_i32, %c0_i32_0 : i32, i32
  }
  func.func @transform_4(%arg0: i32) -> (i32, i32) {
    %c0_i32 = arith.constant 0 : i32
    %c0_i32_0 = arith.constant 0 : i32
    %c0_i32_1 = arith.constant 0 : i32
    return %c0_i32, %c0_i32_0 : i32, i32
  }
  func.func @transform_5(%arg0: i32) -> (i32, i32) {
    %c0_i32 = arith.constant 0 : i32
    %c0_i32_0 = arith.constant 0 : i32
    %c0_i32_1 = arith.constant 0 : i32
    return %c0_i32, %c0_i32_0 : i32, i32
  }
  func.func @transform_6(%arg0: i32) -> (i32, i32) {
    %c0_i32 = arith.constant 0 : i32
    %c0_i32_0 = arith.constant 0 : i32
    %c0_i32_1 = arith.constant 0 : i32
    return %c0_i32, %c0_i32_0 : i32, i32
  }
  func.func @transform_7(%arg0: i32) -> (i32, i32) {
    %c0_i32 = arith.constant 0 : i32
    %c0_i32_0 = arith.constant 0 : i32
    return %arg0, %c0_i32 : i32, i32
  }
}

module attributes {stable_mosaic.version = 11 : i64} {
  func.func @_mlp_fused_kernel(%arg0: i32, %arg1: memref<8x32xbf16, #tpu.memory_space<vmem>>, %arg2: memref<32x128xbf16, #tpu.memory_space<vmem>>, %arg3: memref<1x128xf32, #tpu.memory_space<vmem>>, %arg4: memref<128x128xbf16, #tpu.memory_space<vmem>>, %arg5: memref<1x128xf32, #tpu.memory_space<vmem>>, %arg6: memref<128x16xbf16, #tpu.memory_space<vmem>>, %arg7: memref<1x16xf32, #tpu.memory_space<vmem>>, %arg8: memref<8x16xf32, #tpu.memory_space<vmem>>) attributes {dimension_semantics = [#tpu.dimension_semantics<parallel>], iteration_bounds = array<i64: 1>, scalar_prefetch = 0 : i64, scratch_operands = 0 : i64, tpu.core_type = #tpu.core_type<tc>, window_params = [{transform_indices = @transform_0, window_bounds = array<i64: 8, 32>}, {pipeline_mode = #tpu.pipeline_mode<synchronous>, transform_indices = @transform_1, window_bounds = array<i64: 32, 128>}, {pipeline_mode = #tpu.pipeline_mode<synchronous>, transform_indices = @transform_2, window_bounds = array<i64: 1, 128>}, {pipeline_mode = #tpu.pipeline_mode<synchronous>, transform_indices = @transform_3, window_bounds = array<i64: 128, 128>}, {pipeline_mode = #tpu.pipeline_mode<synchronous>, transform_indices = @transform_4, window_bounds = array<i64: 1, 128>}, {pipeline_mode = #tpu.pipeline_mode<synchronous>, transform_indices = @transform_5, window_bounds = array<i64: 128, 16>}, {pipeline_mode = #tpu.pipeline_mode<synchronous>, transform_indices = @transform_6, window_bounds = array<i64: 1, 16>}, {transform_indices = @transform_7, window_bounds = array<i64: 8, 16>}]} {
    %c0 = arith.constant 0 : index
    %c0_0 = arith.constant 0 : index
    %0 = vector.load %arg1[%c0, %c0_0] : memref<8x32xbf16, #tpu.memory_space<vmem>>, vector<8x32xbf16>
    %c0_1 = arith.constant 0 : index
    %c0_2 = arith.constant 0 : index
    %1 = vector.load %arg2[%c0_1, %c0_2] : memref<32x128xbf16, #tpu.memory_space<vmem>>, vector<32x128xbf16>
    %c0_3 = arith.constant 0 : index
    %c0_4 = arith.constant 0 : index
    %2 = vector.load %arg3[%c0_3, %c0_4] : memref<1x128xf32, #tpu.memory_space<vmem>>, vector<1x128xf32>
    %cst = arith.constant dense<0.000000e+00> : vector<8x128xf32>
    %3 = tpu.matmul %0, %1, %cst {dimension_numbers = #tpu.dot_dimension_numbers<[1], [0], [0], [1], [0, 0, 1, 1], [], []>} : vector<8x32xbf16>, vector<32x128xbf16>, vector<8x128xf32> -> vector<8x128xf32>
    %4 = vector.broadcast %2 : vector<1x128xf32> to vector<8x128xf32>
    %5 = arith.addf %3, %4 : vector<8x128xf32>
    %cst_5 = arith.constant 0.000000e+00 : f32
    %6 = vector.broadcast %cst_5 : f32 to vector<8x128xf32>
    %7 = arith.maximumf %5, %6 : vector<8x128xf32>
    %8 = arith.truncf %7 : vector<8x128xf32> to vector<8x128xbf16>
    %c0_6 = arith.constant 0 : index
    %c0_7 = arith.constant 0 : index
    %9 = vector.load %arg4[%c0_6, %c0_7] : memref<128x128xbf16, #tpu.memory_space<vmem>>, vector<128x128xbf16>
    %c0_8 = arith.constant 0 : index
    %c0_9 = arith.constant 0 : index
    %10 = vector.load %arg5[%c0_8, %c0_9] : memref<1x128xf32, #tpu.memory_space<vmem>>, vector<1x128xf32>
    %cst_10 = arith.constant dense<0.000000e+00> : vector<8x128xf32>
    %11 = tpu.matmul %8, %9, %cst_10 {dimension_numbers = #tpu.dot_dimension_numbers<[1], [0], [0], [1], [0, 0, 1, 1], [], []>} : vector<8x128xbf16>, vector<128x128xbf16>, vector<8x128xf32> -> vector<8x128xf32>
    %12 = vector.broadcast %10 : vector<1x128xf32> to vector<8x128xf32>
    %13 = arith.addf %11, %12 : vector<8x128xf32>
    %cst_11 = arith.constant 0.000000e+00 : f32
    %14 = vector.broadcast %cst_11 : f32 to vector<8x128xf32>
    %15 = arith.maximumf %13, %14 : vector<8x128xf32>
    %16 = arith.truncf %15 : vector<8x128xf32> to vector<8x128xbf16>
    %c0_12 = arith.constant 0 : index
    %c0_13 = arith.constant 0 : index
    %17 = vector.load %arg6[%c0_12, %c0_13] : memref<128x16xbf16, #tpu.memory_space<vmem>>, vector<128x16xbf16>
    %c0_14 = arith.constant 0 : index
    %c0_15 = arith.constant 0 : index
    %18 = vector.load %arg7[%c0_14, %c0_15] : memref<1x16xf32, #tpu.memory_space<vmem>>, vector<1x16xf32>
    %cst_16 = arith.constant dense<0.000000e+00> : vector<8x16xf32>
    %19 = tpu.matmul %16, %17, %cst_16 {dimension_numbers = #tpu.dot_dimension_numbers<[1], [0], [0], [1], [0, 0, 1, 1], [], []>} : vector<8x128xbf16>, vector<128x16xbf16>, vector<8x16xf32> -> vector<8x16xf32>
    %20 = vector.broadcast %18 : vector<1x16xf32> to vector<8x16xf32>
    %21 = arith.addf %19, %20 : vector<8x16xf32>
    %cst_17 = arith.constant 0.000000e+00 : f32
    %22 = vector.broadcast %cst_17 : f32 to vector<8x16xf32>
    %23 = arith.subf %22, %21 : vector<8x16xf32>
    %24 = math.exp %23 : vector<8x16xf32>
    %cst_18 = arith.constant 1.000000e+00 : f32
    %25 = vector.broadcast %cst_18 : f32 to vector<8x16xf32>
    %26 = arith.addf %25, %24 : vector<8x16xf32>
    %27 = tpu.reciprocal %26 : vector<8x16xf32> -> vector<8x16xf32>
    %c0_19 = arith.constant 0 : index
    %c0_20 = arith.constant 0 : index
    %28 = vector.load %arg8[%c0_19, %c0_20] : memref<8x16xf32, #tpu.memory_space<vmem>>, vector<8x16xf32>
    tpu.vector_store %arg8[%c0_19, %c0_20], %27 {strides = array<i32>} : memref<8x16xf32, #tpu.memory_space<vmem>>, vector<8x16xf32>,
    return
  }
  func.func @transform_0(%arg0: i32) -> (i32, i32) {
    %c0_i32 = arith.constant 0 : i32
    %c0_i32_0 = arith.constant 0 : i32
    return %arg0, %c0_i32 : i32, i32
  }
  func.func @transform_1(%arg0: i32) -> (i32, i32) {
    %c0_i32 = arith.constant 0 : i32
    %c0_i32_0 = arith.constant 0 : i32
    %c0_i32_1 = arith.constant 0 : i32
    return %c0_i32, %c0_i32_0 : i32, i32
  }
  func.func @transform_2(%arg0: i32) -> (i32, i32) {
    %c0_i32 = arith.constant 0 : i32
    %c0_i32_0 = arith.constant 0 : i32
    %c0_i32_1 = arith.constant 0 : i32
    return %c0_i32, %c0_i32_0 : i32, i32
  }
  func.func @transform_3(%arg0: i32) -> (i32, i32) {
    %c0_i32 = arith.constant 0 : i32
    %c0_i32_0 = arith.constant 0 : i32
    %c0_i32_1 = arith.constant 0 : i32
    return %c0_i32, %c0_i32_0 : i32, i32
  }
  func.func @transform_4(%arg0: i32) -> (i32, i32) {
    %c0_i32 = arith.constant 0 : i32
    %c0_i32_0 = arith.constant 0 : i32
    %c0_i32_1 = arith.constant 0 : i32
    return %c0_i32, %c0_i32_0 : i32, i32
  }
  func.func @transform_5(%arg0: i32) -> (i32, i32) {
    %c0_i32 = arith.constant 0 : i32
    %c0_i32_0 = arith.constant 0 : i32
    %c0_i32_1 = arith.constant 0 : i32
    return %c0_i32, %c0_i32_0 : i32, i32
  }
  func.func @transform_6(%arg0: i32) -> (i32, i32) {
    %c0_i32 = arith.constant 0 : i32
    %c0_i32_0 = arith.constant 0 : i32
    %c0_i32_1 = arith.constant 0 : i32
    return %c0_i32, %c0_i32_0 : i32, i32
  }
  func.func @transform_7(%arg0: i32) -> (i32, i32) {
    %c0_i32 = arith.constant 0 : i32
    %c0_i32_0 = arith.constant 0 : i32
    return %arg0, %c0_i32 : i32, i32
  }
}

</mosaic_0001>

<bundles_post_ra>
// kernel: fwd.1
= control target key start
LH: loop header
LB: loop body
LE: loop exit
PB: predicated region body
PF: predicated region fallthrough
CT: control target
= control target key end

     0   :  { %v483_v1 = vmov 0.0   ;;  %vm484_vm0 = vmmov 0   ;;  %vm52_vm1 = vcmask 261120   ;;  %s628_s0 = inlined_call_operand.vmem [shape: bf16[8,32], index: 0, kind: input, shape index: {}]   ;;  %s629_s1 = inlined_call_operand.vmem [shape: bf16[32,128], index: 1, kind: input, shape index: {}]   ;;  %s630_s2 = inlined_call_operand.vmem [shape: f32[1,128], index: 2, kind: input, shape index: {}]   ;;  %s631_s3 = inlined_call_operand.vmem [shape: bf16[128,128], index: 3, kind: input, shape index: {}]   ;;  %s632_s4 = inlined_call_operand.vmem [shape: f32[1,128], index: 4, kind: input, shape index: {}]   ;;  %s633_s5 = inlined_call_operand.vmem [shape: bf16[128,16], index: 5, kind: input, shape index: {}]   ;;  %s634_s6 = inlined_call_operand.vmem [shape: f32[1,16], index: 6, kind: input, shape index: {}]   ;;  %s635_s7 = inlined_call_operand.hbm [shape: f32[8,16], index: 7, kind: output, shape index: {}]  }
   0x1   :  { %v437_v0 = vld [vmem:[%s629_s1] sm:$0xff]   ;;  %386 = vmatprep.subr.bf16.mxu0 %v483_v1  ;;  %394 = vmatprep.subr.bf16.mxu1 %v483_v1  ;;  %v438_v2 = vld [vmem:[%s629_s1 + $0x8] sm:$0xff]   ;;  %v441_v6 = vld [vmem:[%s631_s3 + $0x10] sm:$0xff]  }
   0x2   :  { %387 = vmatpush3.bf16.msra.mxu0 %v437_v0  ;;  %390 = vmatprep.mubr.msk.bf16.mxu0 %vm484_vm0, %v483_v1  ;;  %v439_v3 = vld [vmem:[%s631_s3] sm:$0xff]   ;;  %v440_v4 = vld [vmem:[%s631_s3 + $0x8] sm:$0xff]   ;;  %v442_v7 = vld [vmem:[%s631_s3 + $0x18] sm:$0xff]  }
   0x3   :  { %388 = vmatprep.subr.bf16.mxu0 %v483_v1  ;;  %410 = vmatprep.mubr.msk.bf16.mxu1 %vm484_vm0, %v483_v1  ;;  %v28_v5 = vld [vmem:[%s628_s0] sm:$0xf] }
   0x4   :  { %395 = vmatpush3.bf16.msra.mxu1 %v439_v3 }
   0x5   :  { %396 = vmatprep.subr.bf16.mxu1 %v483_v1 }
   0x6   :  { %389 = vmatpush3.bf16.msra.mxu0 %v438_v2 }
   0x7   :  { %414 = vmatprep.subr.bf16.mxu0 %v483_v1 }
   0x8   :  { %397 = vmatpush3.bf16.msra.mxu1 %v440_v4 }
   0x9   :  { %391 = vmatmul.mubr.msk.bf16.vlgmr.msra.gmra.mrb[0].mxu0 %vm52_vm1, %v28_v5  ;;  %398 = vmatprep.subr.bf16.mxu1 %v483_v1 }
   0xa   :  { %430 = vmatprep.mubr.msk.bf16.mxu0 %vm484_vm0, %v483_v1 }
   0xc   :  { %399 = vmatpush3.bf16.msra.mxu1 %v441_v6 }
   0xd   :  { %400 = vmatprep.subr.bf16.mxu1 %v483_v1 }
   0xe   :  { %12 = vsyncpa [#allocation3], 0  ;;  %v443_v8 = vld [vmem:[%s631_s3 + $0x20] sm:$0xff]   ;;  %v444_v9 = vld [vmem:[%s631_s3 + $0x28] sm:$0xff]   ;;  %vm327_vm2 = vcmask 130048  }
   0xf   :  { %v445_v10 = vld [vmem:[%s631_s3 + $0x30] sm:$0xff]   ;;  %v446_v11 = vld [vmem:[%s631_s3 + $0x38] sm:$0xff]   ;;  %v447_v12 = vld [vmem:[%s633_s5] sm:$0xff]  }
  0x10   :  { %401 = vmatpush3.bf16.msra.mxu1 %v442_v7  ;;  %415 = vmatpush3.bf16.msra.mxu0 %v447_v12  ;;  %v448_v13 = vld [vmem:[%s633_s5 + $0x8] sm:$0xff]   ;;  %v449_v14 = vld [vmem:[%s633_s5 + $0x10] sm:$0xff]   ;;  %v450_v15 = vld [vmem:[%s633_s5 + $0x18] sm:$0xff]  }
  0x11   :  { %402 = vmatprep.subr.bf16.mxu1 %v483_v1  ;;  %416 = vmatprep.subr.bf16.mxu0 %v483_v1  ;;  %v451_v16 = vld [vmem:[%s633_s5 + $0x20] sm:$0xff]   ;;  %v452_v17 = vld [vmem:[%s633_s5 + $0x28] sm:$0xff]   ;;  %v453_v26 = vld [vmem:[%s633_s5 + $0x30] sm:$0xff]  }
  0x12   :  { %v343_v18 = vld [vmem:[%s630_s2] ss:$0 sm:$0xff]  ;;  %v454_v27 = vld [vmem:[%s633_s5 + $0x38] sm:$0xff]  }
  0x13   :  { %v347_v28 = vld [vmem:[%s632_s4] ss:$0 sm:$0xff]  ;;  %s485_s4 = smov [#allocation2]  }
  0x14   :  { %403 = vmatpush3.bf16.msra.mxu1 %v443_v8  ;;  %417 = vmatpush3.bf16.msra.mxu0 %v448_v13  ;;  %v356_v36 = vld [vmem:[%s634_s6] ss:$0 sm:$0xff]  ;;  %s335_s5 = sshll.u32 %s485_s4, 4  ;;  %s336_s5 = int_to_ptr.vmem [resolvable:$true] %s335_s5 }
  0x15   :  { %404 = vmatprep.subr.bf16.mxu1 %v483_v1  ;;  %418 = vmatprep.subr.bf16.mxu0 %v483_v1  ;;  %s459_s16 = scalar_lea.vmem %s336_s5, 128  ;;  %p464_p1 = scmp.lt.s32.totalorder %s336_s5, %s336_s5 }
  0x16   :  { %p460_p0 = scmp.ne.s32.totalorder %s336_s5, %s459_s16  ;;  %p465_p2 = scmp.lt.s32.totalorder %s459_s16, %s459_s16 }
  0x18   :  { %405 = vmatpush3.bf16.msra.mxu1 %v444_v9  ;;  %419 = vmatpush3.bf16.msra.mxu0 %v449_v14  ;;  %p466_p3 = por %p465_p2, %p464_p1 }
  0x19   :  { %406 = vmatprep.subr.bf16.mxu1 %v483_v1  ;;  %420 = vmatprep.subr.bf16.mxu0 %v483_v1 }
  0x1a   :  { %p467_p4 = pnand %p466_p3, %p460_p0 }
  0x1c   :  { %407 = vmatpush3.bf16.msra.mxu1 %v445_v10  ;;  %421 = vmatpush3.bf16.msra.mxu0 %v450_v15 }
  0x1d   :  { %408 = vmatprep.subr.bf16.mxu1 %v483_v1  ;;  %422 = vmatprep.subr.bf16.mxu0 %v483_v1 }
  0x20   :  { %409 = vmatpush3.bf16.msra.mxu1 %v446_v11  ;;  %423 = vmatpush3.bf16.msra.mxu0 %v451_v16 }
  0x21   :  { %424 = vmatprep.subr.bf16.mxu0 %v483_v1 }
  0x24   :  { %425 = vmatpush3.bf16.msra.mxu0 %v452_v17 }
  0x25   :  { %426 = vmatprep.subr.bf16.mxu0 %v483_v1 }
  0x28   :  { %427 = vmatpush3.bf16.msra.mxu0 %v453_v26 }
  0x29   :  { %428 = vmatprep.subr.bf16.mxu0 %v483_v1 }
  0x2c   :  { %429 = vmatpush3.bf16.msra.mxu0 %v454_v27 }
  0xdc   :  { %v90_v19 = vpop.f32.mrb[0].mxu0 }
  0xdd   :  { %v91_v20 = vadd.f32 %v343_v18, %v90_v19  ;;  %v392_v21 = vpop.f32.mrb[1].mxu0 }
  0xde   :  { %v93_v22 = vpop.f32.mrb[2].mxu0 }
  0xdf   :  { %v96_v23 = vmax.f32 %v91_v20, 0.0  ;;  %v393_v24 = vpop.f32.mrb[3].mxu0 }
  0xe1   :  { %v97_v25 = vpack.c.bf16 %v96_v23, %v96_v23 }
  0xe3   :  { %411 = vmatmul.mubr.bf16.vlgmr.msra.gmra.mrb[0].mxu1 %v97_v25 }
 0x1b6   :  { %v203_v29 = vpop.f32.mrb[0].mxu1 }
 0x1b7   :  { %v204_v30 = vadd.f32 %v347_v28, %v203_v29  ;;  %v412_v31 = vpop.f32.mrb[1].mxu1 }
 0x1b8   :  { %v206_v32 = vpop.f32.mrb[2].mxu1 }
 0x1b9   :  { %v209_v33 = vmax.f32 %v204_v30, 0.0  ;;  %v413_v34 = vpop.f32.mrb[3].mxu1 }
 0x1bb   :  { %v210_v35 = vpack.c.bf16 %v209_v33, %v209_v33 }
 0x1bd   :  { %431 = vmatmul.mubr.bf16.vlgmr.msra.gmra.mrb[4].mxu0 %v210_v35 }
 0x290   :  { %v316_v37 = vpop.f32.mrb[4].mxu0 }
 0x291   :  { %v317_v38 = vadd.f32 %v356_v36, %v316_v37  ;;  %v432_v39 = vpop.f32.mrb[5].mxu0 }
 0x292   :  { %v319_v40 = vpop.f32.mrb[6].mxu0 }
 0x293   :  { %v322_v41 = vsub.f32 0.0, %v317_v38  ;;  %v433_v42 = vpop.f32.mrb[7].mxu0 }
 0x295   :  { %v323_v43 = vmul.f32 1.442695, %v322_v41 }
 0x297   :  { %455 = vpow2.f32 %v323_v43 }
 0x2a1   :  { %v456_v44 = vpop.eup %455 }
 0x2a2   :  { %v325_v45 = vadd.f32 1.0, %v456_v44 }
 0x2a4   :  { %457 = vrcp.f32 %v325_v45 }
 0x2ae   :  { %v458_v46 = vpop.eup %457 }
 0x2af   :  { %328 = vst.msk [vmem:[#allocation2] sm:$0xff] %vm327_vm2, %v458_v46 }
 0x2b0   :  { %470 = shalt.err (!%p467_p4)
}
 0x2b1   :  { %s471_s18 = scalar_lea.hbm %s635_s7, 128 }
 0x2b2   :  { %p472_p5 = scmp.ne.s32.totalorder %s635_s7, %s471_s18  ;;  %p475_p6 = scmp.lt.u32.totalorder %s471_s18, %s635_s7 }
 0x2b4   :  { %p477_p7 = pnand %p475_p6, %p472_p5 }
 0x2b6   :  { %480 = shalt.err (!%p477_p7)
}
 0x2b7   :  { %338 = dma.vmem_to_hbm [thread:$0]  %s336_s5, 128, %s635_s7, [#allocation3]  }
 0x2b8   :  { %481 = dma.done.wait [#allocation3], 128  }
 0x2b9   :  { %482 = vsyncadd [#allocation3], 4294967168 }
 0x2ba   :  { %342 = vsyncpa [#allocation3], 1 }

// kernel: fwd.1
= control target key start
LH: loop header
LB: loop body
LE: loop exit
PB: predicated region body
PF: predicated region fallthrough
CT: control target
= control target key end

     0   :  { %v483_v1 = vmov 0.0   ;;  %vm484_vm0 = vmmov 0   ;;  %vm52_vm1 = vcmask 261120   ;;  %s628_s0 = inlined_call_operand.vmem [shape: bf16[8,32], index: 0, kind: input, shape index: {}]   ;;  %s629_s1 = inlined_call_operand.vmem [shape: bf16[32,128], index: 1, kind: input, shape index: {}]   ;;  %s630_s2 = inlined_call_operand.vmem [shape: f32[1,128], index: 2, kind: input, shape index: {}]   ;;  %s631_s3 = inlined_call_operand.vmem [shape: bf16[128,128], index: 3, kind: input, shape index: {}]   ;;  %s632_s4 = inlined_call_operand.vmem [shape: f32[1,128], index: 4, kind: input, shape index: {}]   ;;  %s633_s5 = inlined_call_operand.vmem [shape: bf16[128,16], index: 5, kind: input, shape index: {}]   ;;  %s634_s6 = inlined_call_operand.vmem [shape: f32[1,16], index: 6, kind: input, shape index: {}]   ;;  %s635_s7 = inlined_call_operand.hbm [shape: f32[8,16], index: 7, kind: output, shape index: {}]  }
   0x1   :  { %v437_v0 = vld [vmem:[%s629_s1] sm:$0xff]   ;;  %386 = vmatprep.subr.bf16.mxu0 %v483_v1  ;;  %394 = vmatprep.subr.bf16.mxu1 %v483_v1  ;;  %v438_v2 = vld [vmem:[%s629_s1 + $0x8] sm:$0xff]   ;;  %v441_v6 = vld [vmem:[%s631_s3 + $0x10] sm:$0xff]  }
   0x2   :  { %387 = vmatpush3.bf16.msra.mxu0 %v437_v0  ;;  %390 = vmatprep.mubr.msk.bf16.mxu0 %vm484_vm0, %v483_v1  ;;  %v439_v3 = vld [vmem:[%s631_s3] sm:$0xff]   ;;  %v440_v4 = vld [vmem:[%s631_s3 + $0x8] sm:$0xff]   ;;  %v442_v7 = vld [vmem:[%s631_s3 + $0x18] sm:$0xff]  }
   0x3   :  { %388 = vmatprep.subr.bf16.mxu0 %v483_v1  ;;  %410 = vmatprep.mubr.msk.bf16.mxu1 %vm484_vm0, %v483_v1  ;;  %v28_v5 = vld [vmem:[%s628_s0] sm:$0xf] }
   0x4   :  { %395 = vmatpush3.bf16.msra.mxu1 %v439_v3 }
   0x5   :  { %396 = vmatprep.subr.bf16.mxu1 %v483_v1 }
   0x6   :  { %389 = vmatpush3.bf16.msra.mxu0 %v438_v2 }
   0x7   :  { %414 = vmatprep.subr.bf16.mxu0 %v483_v1 }
   0x8   :  { %397 = vmatpush3.bf16.msra.mxu1 %v440_v4 }
   0x9   :  { %391 = vmatmul.mubr.msk.bf16.vlgmr.msra.gmra.mrb[0].mxu0 %vm52_vm1, %v28_v5  ;;  %398 = vmatprep.subr.bf16.mxu1 %v483_v1 }
   0xa   :  { %430 = vmatprep.mubr.msk.bf16.mxu0 %vm484_vm0, %v483_v1 }
   0xc   :  { %399 = vmatpush3.bf16.msra.mxu1 %v441_v6 }
   0xd   :  { %400 = vmatprep.subr.bf16.mxu1 %v483_v1 }
   0xe   :  { %12 = vsyncpa [#allocation3], 0  ;;  %v443_v8 = vld [vmem:[%s631_s3 + $0x20] sm:$0xff]   ;;  %v444_v9 = vld [vmem:[%s631_s3 + $0x28] sm:$0xff]   ;;  %vm327_vm2 = vcmask 130048  }
   0xf   :  { %v445_v10 = vld [vmem:[%s631_s3 + $0x30] sm:$0xff]   ;;  %v446_v11 = vld [vmem:[%s631_s3 + $0x38] sm:$0xff]   ;;  %v447_v12 = vld [vmem:[%s633_s5] sm:$0xff]  }
  0x10   :  { %401 = vmatpush3.bf16.msra.mxu1 %v442_v7  ;;  %415 = vmatpush3.bf16.msra.mxu0 %v447_v12  ;;  %v448_v13 = vld [vmem:[%s633_s5 + $0x8] sm:$0xff]   ;;  %v449_v14 = vld [vmem:[%s633_s5 + $0x10] sm:$0xff]   ;;  %v450_v15 = vld [vmem:[%s633_s5 + $0x18] sm:$0xff]  }
  0x11   :  { %402 = vmatprep.subr.bf16.mxu1 %v483_v1  ;;  %416 = vmatprep.subr.bf16.mxu0 %v483_v1  ;;  %v451_v16 = vld [vmem:[%s633_s5 + $0x20] sm:$0xff]   ;;  %v452_v17 = vld [vmem:[%s633_s5 + $0x28] sm:$0xff]   ;;  %v453_v26 = vld [vmem:[%s633_s5 + $0x30] sm:$0xff]  }
  0x12   :  { %v343_v18 = vld [vmem:[%s630_s2] ss:$0 sm:$0xff]  ;;  %v454_v27 = vld [vmem:[%s633_s5 + $0x38] sm:$0xff]  }
  0x13   :  { %v347_v28 = vld [vmem:[%s632_s4] ss:$0 sm:$0xff]  ;;  %s485_s4 = smov [#allocation2]  }
  0x14   :  { %403 = vmatpush3.bf16.msra.mxu1 %v443_v8  ;;  %417 = vmatpush3.bf16.msra.mxu0 %v448_v13  ;;  %v356_v36 = vld [vmem:[%s634_s6] ss:$0 sm:$0xff]  ;;  %s335_s5 = sshll.u32 %s485_s4, 4  ;;  %s336_s5 = int_to_ptr.vmem [resolvable:$true] %s335_s5 }
  0x15   :  { %404 = vmatprep.subr.bf16.mxu1 %v483_v1  ;;  %418 = vmatprep.subr.bf16.mxu0 %v483_v1  ;;  %s459_s16 = scalar_lea.vmem %s336_s5, 128  ;;  %p464_p1 = scmp.lt.s32.totalorder %s336_s5, %s336_s5 }
  0x16   :  { %p460_p0 = scmp.ne.s32.totalorder %s336_s5, %s459_s16  ;;  %p465_p2 = scmp.lt.s32.totalorder %s459_s16, %s459_s16 }
  0x18   :  { %405 = vmatpush3.bf16.msra.mxu1 %v444_v9  ;;  %419 = vmatpush3.bf16.msra.mxu0 %v449_v14  ;;  %p466_p3 = por %p465_p2, %p464_p1 }
  0x19   :  { %406 = vmatprep.subr.bf16.mxu1 %v483_v1  ;;  %420 = vmatprep.subr.bf16.mxu0 %v483_v1 }
  0x1a   :  { %p467_p4 = pnand %p466_p3, %p460_p0 }
  0x1c   :  { %407 = vmatpush3.bf16.msra.mxu1 %v445_v10  ;;  %421 = vmatpush3.bf16.msra.mxu0 %v450_v15 }
  0x1d   :  { %408 = vmatprep.subr.bf16.mxu1 %v483_v1  ;;  %422 = vmatprep.subr.bf16.mxu0 %v483_v1 }
  0x20   :  { %409 = vmatpush3.bf16.msra.mxu1 %v446_v11  ;;  %423 = vmatpush3.bf16.msra.mxu0 %v451_v16 }
  0x21   :  { %424 = vmatprep.subr.bf16.mxu0 %v483_v1 }
  0x24   :  { %425 = vmatpush3.bf16.msra.mxu0 %v452_v17 }
  0x25   :  { %426 = vmatprep.subr.bf16.mxu0 %v483_v1 }
  0x28   :  { %427 = vmatpush3.bf16.msra.mxu0 %v453_v26 }
  0x29   :  { %428 = vmatprep.subr.bf16.mxu0 %v483_v1 }
  0x2c   :  { %429 = vmatpush3.bf16.msra.mxu0 %v454_v27 }
  0xdc   :  { %v90_v19 = vpop.f32.mrb[0].mxu0 }
  0xdd   :  { %v91_v20 = vadd.f32 %v343_v18, %v90_v19  ;;  %v392_v21 = vpop.f32.mrb[1].mxu0 }
  0xde   :  { %v93_v22 = vpop.f32.mrb[2].mxu0 }
  0xdf   :  { %v96_v23 = vmax.f32 %v91_v20, 0.0  ;;  %v393_v24 = vpop.f32.mrb[3].mxu0 }
  0xe1   :  { %v97_v25 = vpack.c.bf16 %v96_v23, %v96_v23 }
  0xe3   :  { %411 = vmatmul.mubr.bf16.vlgmr.msra.gmra.mrb[0].mxu1 %v97_v25 }
 0x1b6   :  { %v203_v29 = vpop.f32.mrb[0].mxu1 }
 0x1b7   :  { %v204_v30 = vadd.f32 %v347_v28, %v203_v29  ;;  %v412_v31 = vpop.f32.mrb[1].mxu1 }
 0x1b8   :  { %v206_v32 = vpop.f32.mrb[2].mxu1 }
 0x1b9   :  { %v209_v33 = vmax.f32 %v204_v30, 0.0  ;;  %v413_v34 = vpop.f32.mrb[3].mxu1 }
 0x1bb   :  { %v210_v35 = vpack.c.bf16 %v209_v33, %v209_v33 }
 0x1bd   :  { %431 = vmatmul.mubr.bf16.vlgmr.msra.gmra.mrb[4].mxu0 %v210_v35 }
 0x290   :  { %v316_v37 = vpop.f32.mrb[4].mxu0 }
 0x291   :  { %v317_v38 = vadd.f32 %v356_v36, %v316_v37  ;;  %v432_v39 = vpop.f32.mrb[5].mxu0 }
 0x292   :  { %v319_v40 = vpop.f32.mrb[6].mxu0 }
 0x293   :  { %v322_v41 = vsub.f32 0.0, %v317_v38  ;;  %v433_v42 = vpop.f32.mrb[7].mxu0 }
 0x295   :  { %v323_v43 = vmul.f32 1.442695, %v322_v41 }
 0x297   :  { %455 = vpow2.f32 %v323_v43 }
 0x2a1   :  { %v456_v44 = vpop.eup %455 }
 0x2a2   :  { %v325_v45 = vadd.f32 1.0, %v456_v44 }
 0x2a4   :  { %457 = vrcp.f32 %v325_v45 }
 0x2ae   :  { %v458_v46 = vpop.eup %457 }
 0x2af   :  { %328 = vst.msk [vmem:[#allocation2] sm:$0xff] %vm327_vm2, %v458_v46 }
 0x2b0   :  { %470 = shalt.err (!%p467_p4)
}
 0x2b1   :  { %s471_s18 = scalar_lea.hbm %s635_s7, 128 }
 0x2b2   :  { %p472_p5 = scmp.ne.s32.totalorder %s635_s7, %s471_s18  ;;  %p475_p6 = scmp.lt.u32.totalorder %s471_s18, %s635_s7 }
 0x2b4   :  { %p477_p7 = pnand %p475_p6, %p472_p5 }
 0x2b6   :  { %480 = shalt.err (!%p477_p7)
}
 0x2b7   :  { %338 = dma.vmem_to_hbm [thread:$0]  %s336_s5, 128, %s635_s7, [#allocation3]  }
 0x2b8   :  { %481 = dma.done.wait [#allocation3], 128  }
 0x2b9   :  { %482 = vsyncadd [#allocation3], 4294967168 }
 0x2ba   :  { %342 = vsyncpa [#allocation3], 1 }

</bundles_post_ra>
